<compile_context>
chip_gen: v7x
topology: tpu7x:2x2x1
jax: 0.10.0
libtpu: 0.0.40
codegen_flags: <defaults>
</compile_context>

<pallas_src>
import jax
import jax.numpy as jnp
from jax import lax
from jax.experimental import pallas as pl
from jax.experimental.pallas import tpu as pltpu

_LANE = 512        # lane-dense last dim (multiple of 128)
_SUBLANE = 8       # f32 sublane quantum
_BLOCK_ROWS = 1024 # rows per grid step -> 1024*512*4B = 2 MiB per f32 buffer
_PALLAS_MIN_BYTES = 1 << 20  # below this, plain jnp beats pallas_call overhead


def _act(x, act_name):
    """Resolve the stored activation at trace time; unknown names raise."""
    if act_name == "relu":
        return jnp.maximum(x, 0.0)
    if act_name == "tanh":
        return jnp.tanh(x)
    if act_name == "sigmoid":
        return jax.nn.sigmoid(x)
    if act_name in ("identity", "linear", None):
        return x
    raise ValueError(f"unsupported activation: {act_name!r}")


def _make_kernel(act_name, dropout, deterministic):
    apply_dropout = (dropout > 0.0) and (not deterministic)
    keep_prob = 1.0 - float(dropout)

    def kernel(seed_ref, x_ref, o_ref):
        # Upcast to f32 for compute (free relative to memory; required on v5e
        # where the VPU/EUP have no bf16 path).
        x = x_ref[...].astype(jnp.float32)
        y = _act(x, act_name)
        if apply_dropout:
            # Fused inverted dropout: PRNG + select ride on slots that have
            # huge slack in a mem-bound kernel -> essentially free.
            pltpu.prng_seed(seed_ref[0] + pl.program_id(0))
            bits = pltpu.bitcast(pltpu.prng_random_bits(y.shape), jnp.uint32)
            u = lax.shift_right_logical(bits, jnp.uint32(8)).astype(jnp.float32)
            u = u * jnp.float32(1.0 / (1 << 24))          # uniform in [0, 1)
            keep = u < jnp.float32(keep_prob)
            y = jnp.where(keep, y * jnp.float32(1.0 / keep_prob),
                          jnp.float32(0.0))
        o_ref[...] = y.astype(o_ref.dtype)

    return kernel


def _apply_act_ref(hidden, act_name, dropout, deterministic, seed):
    """Plain-JAX path for tiny tensors (and the correctness reference)."""
    y = _act(hidden.astype(jnp.float32), act_name)
    if dropout > 0.0 and not deterministic:
        key = jax.random.PRNGKey(seed)
        keep = jax.random.bernoulli(key, 1.0 - dropout, hidden.shape)
        y = jnp.where(keep, y / (1.0 - dropout), 0.0)
    return y.astype(hidden.dtype)


def apply_act_pallas(hidden, act_name="relu", dropout=0.0, *,
                     deterministic=True, seed=0, force_pallas=False):
    """Apply the stored activation (+ optional fused dropout) via Pallas.

    hidden: any-shaped float32/bfloat16 tensor.  Returns same shape/dtype.
    """
    orig_shape = hidden.shape
    dtype = hidden.dtype
    n = int(hidden.size)

    if n == 0:
        return hidden
    if (not force_pallas) and n * dtype.itemsize < _PALLAS_MIN_BYTES:
        # pallas_call fixed overhead dwarfs the useful work at these sizes.
        return _apply_act_ref(hidden, act_name, dropout, deterministic, seed)

    # ---- lane-dense 2-D slab: (rows, _LANE), rows padded so the grid tiles
    # evenly and the block satisfies the (8, 128) constraint. ----------------
    lane = _LANE
    rows = pl.cdiv(n, lane)
    rows8 = ((rows + _SUBLANE - 1) // _SUBLANE) * _SUBLANE
    tm = min(_BLOCK_ROWS, rows8)                      # multiple of 8
    rows_padded = ((rows + tm - 1) // tm) * tm
    padded = rows_padded * lane

    flat = hidden.reshape(-1)
    if padded != n:
        flat = jnp.pad(flat, (0, padded - n))         # glue pad in plain JAX
    x2d = flat.reshape(rows_padded, lane)

    grid = (rows_padded // tm,)
    kernel = _make_kernel(act_name, float(dropout), deterministic)
    seed_arr = jnp.asarray([seed], dtype=jnp.int32)

    out2d = pl.pallas_call(
        kernel,
        out_shape=jax.ShapeDtypeStruct((rows_padded, lane), dtype),
        grid_spec=pltpu.PrefetchScalarGridSpec(
            num_scalar_prefetch=1,
            grid=grid,
            in_specs=[pl.BlockSpec((tm, lane), lambda i, seed_ref: (i, 0))],
            out_specs=pl.BlockSpec((tm, lane), lambda i, seed_ref: (i, 0)),
        ),
        compiler_params=pltpu.CompilerParams(
            dimension_semantics=("parallel",),
        ),
    )(seed_arr, x2d)

    return out2d.reshape(-1)[:n].reshape(orig_shape)


class Aggregator:
    """JAX port of the PyTorch Aggregator base class."""

    def __init__(self, batch_size, dim, dropout, act, name=None):
        # __init__ creates no parameters in the reference module.
        self.dropout = dropout
        self.act = act
        self.batch_size = batch_size
        self.dim = dim
        self.name = name

    def forward(self):
        # Reference implementation is `pass` -> returns None.
        return None

    # Stand-in compute path exercising the stored activation (+dropout).
    def apply_act(self, hidden, *, deterministic=True, seed=0,
                  force_pallas=False):
        return apply_act_pallas(hidden, act_name=self.act,
                                dropout=self.dropout,
                                deterministic=deterministic, seed=seed,
                                force_pallas=force_pallas)


if __name__ == "__main__":
    batch_size = 2
    seq = 8
    dim = 32
    dropout = 0.0
    act = "relu"

    agg = Aggregator(batch_size, dim, dropout, act)

    # Faithful forward-pass semantics: no inputs, returns None.
    assert agg.forward() is None

    key = jax.random.PRNGKey(0)
    k_small, k_big = jax.random.split(key)

    # 1) Small shape implied by the module (force the Pallas path so the
    #    kernel is actually exercised despite the tiny size).
    hidden = jax.random.normal(k_small, (batch_size, seq, dim),
                               dtype=jnp.float32)
    out = agg.apply_act(hidden, force_pallas=True)
    out = jax.block_until_ready(out)
    ref = jnp.maximum(hidden, 0.0)
    assert out.shape == (batch_size, seq, dim)
    assert out.dtype == hidden.dtype
    assert jnp.allclose(out, ref, atol=1e-6)

    # 2) Moderately sized check that exercises the multi-block pipelined grid
    #    (8*256*512 f32 = 4 MiB -> 2 grid steps of 1024x512).
    big = jax.random.normal(k_big, (8, 256, 512), dtype=jnp.float32)
    out_big = jax.block_until_ready(apply_act_pallas(big, act_name="tanh"))
    assert jnp.allclose(out_big, jnp.tanh(big), atol=1e-5)

    print("KERNEL_OK")
</pallas_src>

<mosaic_0001>
module attributes {stable_mosaic.version = 11 : i64} {
  func.func @kernel(%arg0: i32, %arg1: memref<1xi32, #tpu.memory_space<smem>>, %arg2: memref<8x512xf32, #tpu.memory_space<vmem>>, %arg3: memref<8x512xf32, #tpu.memory_space<vmem>>) attributes {dimension_semantics = [#tpu.dimension_semantics<parallel>], iteration_bounds = array<i64: 1>, scalar_prefetch = 1 : i64, scratch_operands = 0 : i64, tpu.core_type = #tpu.core_type<tc>, window_params = [{transform_indices = @transform_0, window_bounds = array<i64: 8, 512>}, {transform_indices = @transform_1, window_bounds = array<i64: 8, 512>}]} {
    %c0 = arith.constant 0 : index
    %c0_0 = arith.constant 0 : index
    %0 = vector.load %arg2[%c0, %c0_0] : memref<8x512xf32, #tpu.memory_space<vmem>>, vector<8x512xf32>
    %cst = arith.constant 0.000000e+00 : f32
    %1 = vector.broadcast %cst : f32 to vector<8x512xf32>
    %2 = arith.maximumf %0, %1 : vector<8x512xf32>
    %c0_1 = arith.constant 0 : index
    %c0_2 = arith.constant 0 : index
    %3 = vector.load %arg3[%c0_1, %c0_2] : memref<8x512xf32, #tpu.memory_space<vmem>>, vector<8x512xf32>
    tpu.vector_store %arg3[%c0_1, %c0_2], %2 {strides = array<i32>} : memref<8x512xf32, #tpu.memory_space<vmem>>, vector<8x512xf32>,
    return
  }
  func.func @transform_0(%arg0: i32, %arg1: memref<1xi32, #tpu.memory_space<smem>>) -> (i32, i32) {
    %c0_i32 = arith.constant 0 : i32
    %c0_i32_0 = arith.constant 0 : i32
    return %arg0, %c0_i32 : i32, i32
  }
  func.func @transform_1(%arg0: i32, %arg1: memref<1xi32, #tpu.memory_space<smem>>) -> (i32, i32) {
    %c0_i32 = arith.constant 0 : i32
    %c0_i32_0 = arith.constant 0 : i32
    return %arg0, %c0_i32 : i32, i32
  }
}

</mosaic_0001>

<bundles_post_ra>
// kernel: tpu_custom_call.1
= control target key start
LH: loop header
LB: loop body
LE: loop exit
PB: predicated region body
PF: predicated region fallthrough
CT: control target
= control target key end

     0   :  { %8 = vsyncpa [#allocation5], 0  ;;  %s141_s0 = inlined_call_operand.<no memory space> [shape: s32[1], index: 0, kind: input, shape index: {}]   ;;  %s142_s1 = inlined_call_operand.hbm [shape: f32[8,512], index: 1, kind: input, shape index: {}]   ;;  %s143_s2 = inlined_call_operand.hbm [shape: f32[8,512], index: 2, kind: output, shape index: {}]  }
   0x1   :  { %9 = vsyncpa [#allocation6], 0  ;;  %s100_s9 = smov [#allocation4]   ;;  %s52_s13 = scalar_lea.hbm %s142_s1, 512 }
   0x2   :  { %s16_s10 = sshll.u32 %s100_s9, 4  ;;  %p53_p0 = scmp.ne.s32.totalorder %s142_s1, %s52_s13  ;;  %s17_s10 = int_to_ptr.vmem [resolvable:$true] %s16_s10 }
   0x3   :  { %p56_p1 = scmp.lt.u32.totalorder %s52_s13, %s142_s1 }
   0x5   :  { %p58_p2 = pnand %p56_p1, %p53_p0 }
   0x7   :  { %61 = shalt.err (!%p58_p2)
}
   0x8   :  { %s62_s17 = scalar_lea.vmem %s17_s10, 512  ;;  %p67_p4 = scmp.lt.s32.totalorder %s17_s10, %s17_s10 }
   0x9   :  { %p63_p3 = scmp.ne.s32.totalorder %s17_s10, %s62_s17  ;;  %p68_p5 = scmp.lt.s32.totalorder %s62_s17, %s62_s17 }
   0xb   :  { %p69_p6 = por %p68_p5, %p67_p4 }
   0xd   :  { %p70_p7 = pnand %p69_p6, %p63_p3 }
   0xf   :  { %73 = shalt.err (!%p70_p7)
}
  0x10   :  { %19 = dma.hbm_to_vmem [thread:$0]  %s142_s1, 512, %s17_s10, [#allocation5]  }
  0x11   :  { %96 = dma.done.wait [#allocation5], 512  }
  0x12   :  { %97 = vsyncadd [#allocation5], 4294966784  ;;  %s101_s20 = smov [#allocation7]   ;;  %v23_v0 = vld [vmem:[#allocation4] sm:$0xff]  ;;  %v24_v1 = vld [vmem:[#allocation4 + $0x8] sm:$0xff] }
  0x13   :  { %s41_s21 = sshll.u32 %s101_s20, 4  ;;  %v25_v2 = vld [vmem:[#allocation4 + $0x10] sm:$0xff]  ;;  %v27_v3 = vmax.f32 %v23_v0, 0.0  ;;  %v28_v4 = vmax.f32 %v24_v1, 0.0  ;;  %v26_v6 = vld [vmem:[#allocation4 + $0x18] sm:$0xff]  ;;  %s42_s21 = int_to_ptr.vmem [resolvable:$true] %s41_s21 }
  0x14   :  { %v29_v5 = vmax.f32 %v25_v2, 0.0  ;;  %v30_v7 = vmax.f32 %v26_v6, 0.0  ;;  %s74_s22 = scalar_lea.vmem %s42_s21, 512  ;;  %p79_p9 = scmp.lt.s32.totalorder %s42_s21, %s42_s21 }
  0x15   :  { %31 = vst [vmem:[#allocation7] sm:$0xff] %v27_v3  ;;  %32 = vst [vmem:[#allocation7 + $0x8] sm:$0xff] %v28_v4  ;;  %p75_p8 = scmp.ne.s32.totalorder %s42_s21, %s74_s22  ;;  %p80_p10 = scmp.lt.s32.totalorder %s74_s22, %s74_s22 }
  0x16   :  { %33 = vst [vmem:[#allocation7 + $0x10] sm:$0xff] %v29_v5  ;;  %34 = vst [vmem:[#allocation7 + $0x18] sm:$0xff] %v30_v7 }
  0x17   :  { %p81_p11 = por %p80_p10, %p79_p9 }
  0x19   :  { %p82_p12 = pnand %p81_p11, %p75_p8 }
  0x1b   :  { %85 = shalt.err (!%p82_p12)
}
  0x1c   :  { %s86_s24 = scalar_lea.hbm %s143_s2, 512 }
  0x1d   :  { %p87_p13 = scmp.ne.s32.totalorder %s143_s2, %s86_s24  ;;  %p90_p0 = scmp.lt.u32.totalorder %s86_s24, %s143_s2 }
  0x1f   :  { %p92_p1 = pnand %p90_p0, %p87_p13 }
  0x21   :  { %95 = shalt.err (!%p92_p1)
}
  0x22   :  { %44 = dma.vmem_to_hbm [thread:$0]  %s42_s21, 512, %s143_s2, [#allocation6]  }
  0x23   :  { %98 = dma.done.wait [#allocation6], 512  }
  0x24   :  { %99 = vsyncadd [#allocation6], 4294966784 }
  0x25   :  { %48 = vsyncpa [#allocation5], 1 }
  0x26   :  { %49 = vsyncpa [#allocation6], 1 }

</bundles_post_ra>
